<compile_context>
chip_gen: v6e
topology: v6e:2x2x1
jax: 0.10.0
libtpu: 0.0.40
codegen_flags: <defaults>
</compile_context>

<pallas_src>
import functools

import jax
import jax.numpy as jnp
from jax.experimental import pallas as pl
from jax.experimental.pallas import tpu as pltpu


_LIVE_SET_MULTIPLIER = 10            # ~2x in + 2x out double-buffers + f32 temps
_MIN_GRID_STEPS = 4                  # keep the pipeline / both v7x TCs busy
_MAX_VMEM_LIMIT = 96 * 1024 * 1024   # upper bound for the scoped VMEM request


def _round_up(x, m):
    return -(-x // m) * m


def _vmem_limit_bytes():
    """Generation-aware scoped-VMEM request (v5e/v6e: ~96 MiB, v7x: ~48 MiB)."""
    cap = 0
    try:
        cap = int(getattr(pltpu.get_tpu_info(), "vmem_capacity_bytes", 0) or 0)
    except Exception:
        cap = 0
    if cap <= 0:
        cap = 64 * 1024 * 1024       # conservative default (v7x per-core VMEM)
    return int(min(cap * 3 // 4, _MAX_VMEM_LIMIT))


def _pick_rows_per_block(n_rows, lanes, vmem_limit):
    """Rows (slabs) per block: big blocks within the VMEM budget, >=4 grid steps."""
    row_bytes = lanes * 4            # f32 compute copy dominates
    budget_rows = max(1, (vmem_limit // _LIVE_SET_MULTIPLIER) // row_bytes)
    target_rows = max(1, -(-n_rows // _MIN_GRID_STEPS))
    tbn = min(budget_rows, target_rows, n_rows)
    if tbn >= n_rows:
        return n_rows                # block == full dim: always a legal block shape
    tbn = max(8, (tbn // 8) * 8)     # second-minor block dim must be a multiple of 8
    return min(tbn, n_rows)


def _blur_kernel(x_ref, idx_ref, o_ref, *, H, W, L):
    """x_ref: (tbn, Lp) flattened slabs (lane-padded); idx_ref: (2, Lp) int32
    per-lane (w, h) coordinates; o_ref: (tbn, L) output slabs."""
    Lp = x_ref.shape[-1]
    cdt = jnp.bfloat16 if x_ref.dtype == jnp.bfloat16 else jnp.float32
    x = x_ref[...].astype(cdt)

    wi = idx_ref[0:1, :]                       # (1, Lp): lane -> w coordinate
    hi = idx_ref[1:2, :]                       # (1, Lp): lane -> h coordinate
    w_first = wi == 0
    w_last = wi == W - 1
    h_first = hi == 0
    h_last = hi == H - 1

    # ---- horizontal [1,2,1] pass, reflect at w edges (XLU rolls + VPU selects) ----
    left_c = pltpu.roll(x, shift=1, axis=1)          # left_c[l]  = x[l-1] (circular)
    right_c = pltpu.roll(x, shift=Lp - 1, axis=1)    # right_c[l] = x[l+1] (circular)
    left = jnp.where(w_first, right_c, left_c)       # reflect: x[w=-1] -> x[w=1]
    right = jnp.where(w_last, left_c, right_c)       # reflect: x[w=W]  -> x[w=W-2]
    h = left + right + x + x                         # (tbn, Lp)

    # ---- vertical [1,2,1] pass, reflect at h edges (shift by +-W lanes) ----
    up_c = pltpu.roll(h, shift=W, axis=1)            # up_c[l]   = h[l-W] (circular)
    down_c = pltpu.roll(h, shift=Lp - W, axis=1)     # down_c[l] = h[l+W] (circular)
    up = jnp.where(h_first, down_c, up_c)            # reflect: row -1 -> row 1
    down = jnp.where(h_last, up_c, down_c)           # reflect: row H  -> row H-2
    v = up + down + h + h

    res = v * (1.0 / 16.0)
    o_ref[...] = res[:, :L].astype(o_ref.dtype)


def blur(x):
    """Pallas equivalent of Blur.forward. x: (B, C, H, W) -> same shape/dtype."""
    B, C, H, W = x.shape
    if H < 2 or W < 2:
        raise ValueError("reflect padding for the 3x3 blur requires H >= 2 and W >= 2")
    N = B * C
    L = H * W
    Lp = _round_up(L, 128)

    xr = x.reshape(N, L)                 # contiguous reshape: free, no HBM pass
    if Lp != L:
        # TODO(synk): extra HBM pass only in the lane-unaligned case (see header).
        xr = jnp.pad(xr, ((0, 0), (0, Lp - L)))

    lanes = jnp.arange(Lp, dtype=jnp.int32)
    idx = jnp.stack([lanes % W, lanes // W])     # (2, Lp) int32, ~8 KiB

    vmem_limit = _vmem_limit_bytes()
    tbn = _pick_rows_per_block(N, Lp, vmem_limit)
    grid = (pl.cdiv(N, tbn),)            # divisor-free: ragged last block is masked

    kernel = functools.partial(_blur_kernel, H=H, W=W, L=L)
    out = pl.pallas_call(
        kernel,
        out_shape=jax.ShapeDtypeStruct((N, L), x.dtype),
        grid=grid,
        in_specs=[
            pl.BlockSpec((tbn, Lp), lambda i: (i, 0)),
            pl.BlockSpec((2, Lp), lambda i: (0, 0)),
        ],
        out_specs=pl.BlockSpec((tbn, L), lambda i: (i, 0)),
        compiler_params=pltpu.CompilerParams(
            dimension_semantics=("parallel",),
            vmem_limit_bytes=vmem_limit,
        ),
    )(xr, idx)
    return out.reshape(B, C, H, W)


def _blur_reference(x):
    """Pure-JAX reference (depthwise conv, reflect pad) for correctness checking."""
    B, C, H, W = x.shape
    f = jnp.array([1.0, 2.0, 1.0], dtype=jnp.float32)
    k = f[None, :] * f[:, None]
    k = k / jnp.sum(k)
    xp = jnp.pad(x, ((0, 0), (0, 0), (1, 1), (1, 1)), mode="reflect")
    kern = jnp.broadcast_to(k[None, None, :, :], (C, 1, 3, 3)).astype(x.dtype)
    return jax.lax.conv_general_dilated(
        xp, kern, window_strides=(1, 1), padding="VALID",
        dimension_numbers=("NCHW", "OIHW", "NCHW"),
        feature_group_count=C,
    )


if __name__ == "__main__":
    k1, k2, k3 = jax.random.split(jax.random.PRNGKey(0), 3)

    # Case 1: primary shape; lane dim H*W = 256 (128-aligned), N = 8.
    x1 = jax.random.normal(k1, (2, 4, 16, 16), dtype=jnp.float32)
    y1 = jax.block_until_ready(blur(x1))
    assert y1.shape == x1.shape and y1.dtype == x1.dtype
    assert jnp.allclose(y1, _blur_reference(x1), atol=1e-5, rtol=1e-5), "mismatch (case 1)"

    # Case 2: non-square, lane-unaligned H*W = 960 (padded to 1024), odd N.
    x2 = jax.random.normal(k2, (1, 3, 24, 40), dtype=jnp.float32)
    y2 = jax.block_until_ready(blur(x2))
    assert jnp.allclose(y2, _blur_reference(x2), atol=1e-5, rtol=1e-5), "mismatch (case 2)"

    # Case 3: N = 10 not divisible by the 8-row block -> ragged last grid step.
    x3 = jax.random.normal(k3, (5, 2, 8, 16), dtype=jnp.float32)
    y3 = jax.block_until_ready(blur(x3))
    assert jnp.allclose(y3, _blur_reference(x3), atol=1e-5, rtol=1e-5), "mismatch (case 3)"

    print("KERNEL_OK")
</pallas_src>

<mosaic_0001>
module attributes {stable_mosaic.version = 11 : i64} {
  func.func @_blur_kernel(%arg0: i32, %arg1: memref<8x256xf32, #tpu.memory_space<vmem>>, %arg2: memref<2x256xi32, #tpu.memory_space<vmem>>, %arg3: memref<8x256xf32, #tpu.memory_space<vmem>>) attributes {dimension_semantics = [#tpu.dimension_semantics<parallel>], iteration_bounds = array<i64: 1>, scalar_prefetch = 0 : i64, scratch_operands = 0 : i64, tpu.core_type = #tpu.core_type<tc>, window_params = [{transform_indices = @transform_0, window_bounds = array<i64: 8, 256>}, {pipeline_mode = #tpu.pipeline_mode<synchronous>, transform_indices = @transform_1, window_bounds = array<i64: 2, 256>}, {transform_indices = @transform_2, window_bounds = array<i64: 8, 256>}]} {
    %c0 = arith.constant 0 : index
    %c0_0 = arith.constant 0 : index
    %0 = vector.load %arg1[%c0, %c0_0] : memref<8x256xf32, #tpu.memory_space<vmem>>, vector<8x256xf32>
    %c0_1 = arith.constant 0 : index
    %c0_2 = arith.constant 0 : index
    %1 = vector.load %arg2[%c0_1, %c0_2] : memref<2x256xi32, #tpu.memory_space<vmem>>, vector<1x256xi32>
    %c1 = arith.constant 1 : index
    %c0_3 = arith.constant 0 : index
    %2 = vector.load %arg2[%c1, %c0_3] : memref<2x256xi32, #tpu.memory_space<vmem>>, vector<1x256xi32>
    %c0_i32 = arith.constant 0 : i32
    %3 = vector.broadcast %c0_i32 : i32 to vector<1x256xi32>
    %4 = arith.cmpi eq, %1, %3 : vector<1x256xi32>
    %c15_i32 = arith.constant 15 : i32
    %5 = vector.broadcast %c15_i32 : i32 to vector<1x256xi32>
    %6 = arith.cmpi eq, %1, %5 : vector<1x256xi32>
    %c0_i32_4 = arith.constant 0 : i32
    %7 = vector.broadcast %c0_i32_4 : i32 to vector<1x256xi32>
    %8 = arith.cmpi eq, %2, %7 : vector<1x256xi32>
    %c15_i32_5 = arith.constant 15 : i32
    %9 = vector.broadcast %c15_i32_5 : i32 to vector<1x256xi32>
    %10 = arith.cmpi eq, %2, %9 : vector<1x256xi32>
    %c1_i32 = arith.constant 1 : i32
    %11 = tpu.dynamic_rotate %0 by %c1_i32 dim 1 : vector<8x256xf32>, i32 -> vector<8x256xf32>
    %c255_i32 = arith.constant 255 : i32
    %12 = tpu.dynamic_rotate %0 by %c255_i32 dim 1 : vector<8x256xf32>, i32 -> vector<8x256xf32>
    %13 = vector.shape_cast %4 : vector<1x256xi1> to vector<1x256xi1>
    %14 = vector.broadcast %13 : vector<1x256xi1> to vector<8x256xi1>
    %15 = arith.select %14, %12, %11 : vector<8x256xi1>, vector<8x256xf32>
    %16 = vector.shape_cast %6 : vector<1x256xi1> to vector<1x256xi1>
    %17 = vector.broadcast %16 : vector<1x256xi1> to vector<8x256xi1>
    %18 = arith.select %17, %11, %12 : vector<8x256xi1>, vector<8x256xf32>
    %19 = arith.addf %15, %18 : vector<8x256xf32>
    %20 = arith.addf %19, %0 : vector<8x256xf32>
    %21 = arith.addf %20, %0 : vector<8x256xf32>
    %c16_i32 = arith.constant 16 : i32
    %22 = tpu.dynamic_rotate %21 by %c16_i32 dim 1 : vector<8x256xf32>, i32 -> vector<8x256xf32>
    %c240_i32 = arith.constant 240 : i32
    %23 = tpu.dynamic_rotate %21 by %c240_i32 dim 1 : vector<8x256xf32>, i32 -> vector<8x256xf32>
    %24 = vector.shape_cast %8 : vector<1x256xi1> to vector<1x256xi1>
    %25 = vector.broadcast %24 : vector<1x256xi1> to vector<8x256xi1>
    %26 = arith.select %25, %23, %22 : vector<8x256xi1>, vector<8x256xf32>
    %27 = vector.shape_cast %10 : vector<1x256xi1> to vector<1x256xi1>
    %28 = vector.broadcast %27 : vector<1x256xi1> to vector<8x256xi1>
    %29 = arith.select %28, %22, %23 : vector<8x256xi1>, vector<8x256xf32>
    %30 = arith.addf %26, %29 : vector<8x256xf32>
    %31 = arith.addf %30, %21 : vector<8x256xf32>
    %32 = arith.addf %31, %21 : vector<8x256xf32>
    %cst = arith.constant 6.250000e-02 : f32
    %33 = vector.broadcast %cst : f32 to vector<8x256xf32>
    %34 = arith.mulf %32, %33 : vector<8x256xf32>
    %c0_6 = arith.constant 0 : index
    %c0_7 = arith.constant 0 : index
    %35 = vector.load %arg3[%c0_6, %c0_7] : memref<8x256xf32, #tpu.memory_space<vmem>>, vector<8x256xf32>
    tpu.vector_store %arg3[%c0_6, %c0_7], %34 {strides = array<i32>} : memref<8x256xf32, #tpu.memory_space<vmem>>, vector<8x256xf32>,
    return
  }
  func.func @transform_0(%arg0: i32) -> (i32, i32) {
    %c0_i32 = arith.constant 0 : i32
    %c0_i32_0 = arith.constant 0 : i32
    return %arg0, %c0_i32 : i32, i32
  }
  func.func @transform_1(%arg0: i32) -> (i32, i32) {
    %c0_i32 = arith.constant 0 : i32
    %c0_i32_0 = arith.constant 0 : i32
    %c0_i32_1 = arith.constant 0 : i32
    return %c0_i32, %c0_i32_0 : i32, i32
  }
  func.func @transform_2(%arg0: i32) -> (i32, i32) {
    %c0_i32 = arith.constant 0 : i32
    %c0_i32_0 = arith.constant 0 : i32
    return %arg0, %c0_i32 : i32, i32
  }
}

</mosaic_0001>

<bundles_post_ra>
// kernel: tpu_custom_call.1
= control target key start
LH: loop header
LB: loop body
LE: loop exit
PB: predicated region body
PF: predicated region fallthrough
CT: control target
= control target key end

     0   :  { %7 = vsyncpa [#allocation3], 0  ;;  %s265_s0 = inlined_call_operand.hbm [shape: f32[8,256], index: 0, kind: input, shape index: {}]   ;;  %s266_s1 = inlined_call_operand.hbm [shape: s32[2,256], index: 1, kind: input, shape index: {}]   ;;  %s267_s2 = inlined_call_operand.hbm [shape: f32[8,256], index: 2, kind: output, shape index: {}]  }
   0x1   :  { %8 = vsyncpa [#allocation6], 0 }
   0x2   :  { %9 = vsyncpa [#allocation4], 0  ;;  %s233_s9 = smov [#allocation2]   ;;  %s234_s11 = smov [#allocation5]  }
   0x3   :  { %s16_s10 = sshll.u32 %s233_s9, 4  ;;  %s26_s12 = sshll.u32 %s234_s11, 4  ;;  %s17_s10 = int_to_ptr.vmem [resolvable:$true] %s16_s10  ;;  %s27_s12 = int_to_ptr.vmem [resolvable:$true] %s26_s12 }
   0x4   :  { %s175_s13 = scalar_lea.vmem %s17_s10, 256  ;;  %p180_p1 = scmp.lt.s32.totalorder %s17_s10, %s17_s10 }
   0x5   :  { %p176_p0 = scmp.ne.s32.totalorder %s17_s10, %s175_s13  ;;  %p181_p2 = scmp.lt.s32.totalorder %s175_s13, %s175_s13 }
   0x7   :  { %p182_p3 = por %p181_p2, %p180_p1 }
   0x9   :  { %p183_p4 = pnand %p182_p3, %p176_p0 }
   0xb   :  { %186 = shalt.err (!%p183_p4)
}
   0xc   :  { %19 = dma.hbm_to_vmem [thread:$0]  %s265_s0, 256, %s17_s10, [#allocation3]  }
   0xd   :  { %s195_s16 = scalar_lea.vmem %s27_s12, 64  ;;  %p200_p6 = scmp.lt.s32.totalorder %s27_s12, %s27_s12 }
   0xe   :  { %p196_p5 = scmp.ne.s32.totalorder %s27_s12, %s195_s16  ;;  %p201_p7 = scmp.lt.s32.totalorder %s195_s16, %s195_s16 }
  0x10   :  { %p202_p8 = por %p201_p7, %p200_p6 }
  0x12   :  { %p203_p9 = pnand %p202_p8, %p196_p5 }
  0x14   :  { %206 = shalt.err (!%p203_p9)
}
  0x15   :  { %29 = dma.hbm_to_vmem [thread:$0]  %s266_s1, 64, %s27_s12, [#allocation6]  }
  0x16   :  { %227 = dma.done.wait [#allocation3], 256  }
  0x17   :  { %228 = vsyncadd [#allocation3], 4294967040 }
  0x18   :  { %229 = dma.done.wait [#allocation6], 64  }
  0x19   :  { %230 = vsyncadd [#allocation6], 4294967232  ;;  %v36_v0 = vld [vmem:[#allocation2] sm:$0xff]  ;;  %s235_s19 = smov 127   ;;  %s236_s20 = smov 1   ;;  %v37_v1 = vld [vmem:[#allocation2 + $0x8] sm:$0xff]  ;;  %v49_v2 = vlaneseq }
  0x1a   :  { %54 = vrot.lane.b32.xlu1 %v36_v0, %s235_s19  ;;  %45 = vrot.lane.b32.xlu0 %v36_v0, %s236_s20  ;;  %v38_v3 = vld [vmem:[#allocation5] ss:$2 sm:$0x3]  ;;  %v237_v7 = vmov 0   ;;  %s238_s0 = smov 16   ;;  %s239_s1 = smov 112  }
  0x1b   :  { %v63_v4 = vshrl.u32 %v49_v2, 7  ;;  %vm41_vm0 = vcmp.eq.s32.totalorder %v38_v3, 0  ;;  %vm42_vm1 = vcmp.eq.s32.totalorder %v38_v3, 15  ;;  %v50_v10 = vand.u32 127, %v49_v2  ;;  %s240_s21 = smov [#allocation7]  }
  0x1c   :  { %v61_v8 = vsel %vm41_vm0, 1, %v237_v7  ;;  %v74_v9 = vsel %vm42_vm1, 1, %v237_v7  ;;  %v40_v33 = vld [vmem:[#allocation5 + $0x1] ss:$2 sm:$0x3]  ;;  %s149_s22 = sshll.u32 %s240_s21, 4  ;;  %s150_s22 = int_to_ptr.vmem [resolvable:$true] %s149_s22 }
  0x1d   :  { %v64_v5 = vsub.s32 0, %v63_v4  ;;  %v68_v6 = vsub.s32 1, %v63_v4  ;;  %vm58_vm2 = vcmp.lt.s32.totalorder %v50_v10, 127  ;;  %vm51_vm3 = vcmp.lt.s32.totalorder %v50_v10, 1  ;;  %s207_s23 = scalar_lea.vmem %s150_s22, 256  ;;  %p212_p11 = scmp.lt.s32.totalorder %s150_s22, %s150_s22 }
  0x1e   :  { %56 = vrot.lane.b32.xlu1 %v37_v1, %s235_s19  ;;  %47 = vrot.lane.b32.xlu0 %v37_v1, %s236_s20  ;;  %vm43_vm8 = vcmp.eq.s32.totalorder %v40_v33, 0  ;;  %vm44_vm9 = vcmp.eq.s32.totalorder %v40_v33, 15  ;;  %vm97_vm10 = vcmp.lt.s32.totalorder %v50_v10, 16  ;;  %vm104_vm11 = vcmp.lt.s32.totalorder %v50_v10, 112  ;;  %p208_p10 = scmp.ne.s32.totalorder %s150_s22, %s207_s23  ;;  %p213_p12 = scmp.lt.s32.totalorder %s207_s23, %s207_s23 }
  0x1f   :  { %v65_v11 = vrot.slane %v61_v8, %v64_v5  ;;  %v69_v12 = vrot.slane %v61_v8, %v68_v6  ;;  %v78_v13 = vrot.slane %v74_v9, %v64_v5  ;;  %v82_v14 = vrot.slane %v74_v9, %v68_v6 }
  0x20   :  { %v107_v34 = vsel %vm43_vm8, 1, %v237_v7  ;;  %v120_v35 = vsel %vm44_vm9, 1, %v237_v7  ;;  %p214_p13 = por %p213_p12, %p212_p11 }
  0x21   :  { %vm70_vm4 = vcmp.eq.s32.totalorder %v65_v11, 1  ;;  %vm71_vm5 = vcmp.eq.s32.totalorder %v69_v12, 1  ;;  %vm83_vm6 = vcmp.eq.s32.totalorder %v78_v13, 1  ;;  %vm84_vm7 = vcmp.eq.s32.totalorder %v82_v14, 1 }
  0x22   :  { %v111_v36 = vrot.slane %v107_v34, %v64_v5  ;;  %v115_v37 = vrot.slane %v107_v34, %v68_v6  ;;  %v124_v38 = vrot.slane %v120_v35, %v64_v5  ;;  %v128_v39 = vrot.slane %v120_v35, %v68_v6  ;;  %p215_p0 = pnand %p214_p13, %p208_p10 }
  0x24   :  { %vm116_vm12 = vcmp.eq.s32.totalorder %v111_v36, 1  ;;  %vm117_vm13 = vcmp.eq.s32.totalorder %v115_v37, 1  ;;  %vm129_vm14 = vcmp.eq.s32.totalorder %v124_v38, 1  ;;  %vm130_vm15 = vcmp.eq.s32.totalorder %v128_v39, 1 }
  0x8c   :  { %v55_v15 = vpop.permute.xlu1 %54  ;;  %v46_v16 = vpop.permute.xlu0 %45 }
  0x90   :  { %v57_v17 = vpop.permute.xlu1 %56  ;;  %v48_v18 = vpop.permute.xlu0 %47 }
  0x91   :  { %v59_v19 = vsel %vm58_vm2, %v55_v15, %v57_v17  ;;  %v60_v20 = vsel %vm58_vm2, %v57_v17, %v55_v15  ;;  %v52_v21 = vsel %vm51_vm3, %v46_v16, %v48_v18  ;;  %v53_v22 = vsel %vm51_vm3, %v48_v18, %v46_v16 }
  0x92   :  { %v72_v23 = vsel %vm70_vm4, %v59_v19, %v53_v22  ;;  %v73_v24 = vsel %vm71_vm5, %v60_v20, %v52_v21  ;;  %v85_v25 = vsel %vm83_vm6, %v53_v22, %v59_v19  ;;  %v86_v26 = vsel %vm84_vm7, %v52_v21, %v60_v20 }
  0x93   :  { %v87_v27 = vadd.f32 %v85_v25, %v72_v23  ;;  %v88_v28 = vadd.f32 %v86_v26, %v73_v24 }
  0x95   :  { %v89_v29 = vadd.f32 %v87_v27, %v36_v0  ;;  %v90_v30 = vadd.f32 %v88_v28, %v37_v1 }
  0x97   :  { %v91_v31 = vadd.f32 %v89_v29, %v36_v0  ;;  %v92_v32 = vadd.f32 %v90_v30, %v37_v1 }
  0x99   :  { %93 = vrot.lane.b32.xlu0 %v91_v31, %s238_s0  ;;  %95 = vrot.lane.b32.xlu1 %v92_v32, %s238_s0 }
  0x9d   :  { %100 = vrot.lane.b32.xlu0 %v91_v31, %s239_s1  ;;  %102 = vrot.lane.b32.xlu1 %v92_v32, %s239_s1 }
 0x10b   :  { %v94_v40 = vpop.permute.xlu0 %93  ;;  %v96_v41 = vpop.permute.xlu1 %95 }
 0x10c   :  { %v98_v44 = vsel %vm97_vm10, %v94_v40, %v96_v41  ;;  %v99_v45 = vsel %vm97_vm10, %v96_v41, %v94_v40 }
 0x10f   :  { %v101_v42 = vpop.permute.xlu0 %100  ;;  %v103_v43 = vpop.permute.xlu1 %102 }
 0x110   :  { %v105_v46 = vsel %vm104_vm11, %v101_v42, %v103_v43  ;;  %v106_v47 = vsel %vm104_vm11, %v103_v43, %v101_v42 }
 0x111   :  { %v118_v48 = vsel %vm116_vm12, %v105_v46, %v99_v45  ;;  %v119_v49 = vsel %vm117_vm13, %v106_v47, %v98_v44  ;;  %v131_v50 = vsel %vm129_vm14, %v99_v45, %v105_v46  ;;  %v132_v51 = vsel %vm130_vm15, %v98_v44, %v106_v47 }
 0x112   :  { %v133_v52 = vadd.f32 %v131_v50, %v118_v48  ;;  %v134_v53 = vadd.f32 %v132_v51, %v119_v49 }
 0x114   :  { %v135_v54 = vadd.f32 %v133_v52, %v91_v31  ;;  %v136_v55 = vadd.f32 %v134_v53, %v92_v32 }
 0x116   :  { %v137_v56 = vadd.f32 %v135_v54, %v91_v31  ;;  %v138_v57 = vadd.f32 %v136_v55, %v92_v32 }
 0x118   :  { %v139_v58 = vmul.f32 0.0625, %v137_v56  ;;  %v140_v59 = vmul.f32 0.0625, %v138_v57 }
 0x11a   :  { %141 = vst [vmem:[#allocation7] sm:$0xff] %v139_v58  ;;  %142 = vst [vmem:[#allocation7 + $0x8] sm:$0xff] %v140_v59 }
 0x11b   :  { %218 = shalt.err (!%p215_p0)
}
 0x11c   :  { %152 = dma.vmem_to_hbm [thread:$0]  %s150_s22, 256, %s267_s2, [#allocation4]  }
 0x11d   :  { %231 = dma.done.wait [#allocation4], 256  }
 0x11e   :  { %232 = vsyncadd [#allocation4], 4294967040 }
 0x11f   :  { %156 = vsyncpa [#allocation3], 1 }
 0x120   :  { %157 = vsyncpa [#allocation6], 1 }
 0x121   :  { %158 = vsyncpa [#allocation4], 1 }

</bundles_post_ra>
